<compile_context>
chip_gen: v7x
topology: tpu7x:2x2x1
jax: 0.10.0
libtpu: 0.0.40
codegen_flags: <defaults>
</compile_context>

<pallas_src>
import jax
import jax.numpy as jnp
from jax.experimental import pallas as pl
from jax.experimental.pallas import tpu as pltpu


def _classifier_kernel(x_ref, w_ref, b_ref, mask_ref, out_ref):
    # x_ref:    (TM, H)  native dtype (bf16/f32), VMEM tile of the flattened input
    # w_ref:    (H, 1)   same dtype as x, VMEM, resident across all grid steps
    # b_ref:    (1,)     f32, SMEM scalar bias
    # mask_ref: (TM, 1)  f32, VMEM
    # out_ref:  (TM, 1)  f32, VMEM
    h = jnp.dot(x_ref[...], w_ref[...], preferred_element_type=jnp.float32)
    h = h + b_ref[0]
    out_ref[...] = jax.nn.sigmoid(h) * mask_ref[...]


def classifier_forward(x, mask_cls, weight, bias, *, block_m=1024):
    """x: [B, S, H] (bf16 or f32); mask_cls: [B, S] (any dtype, cast to float);
    weight: [1, H] (PyTorch nn.Linear layout); bias: [1]. Returns [B, S] f32."""
    B, S, H = x.shape
    M = B * S
    dtype = x.dtype
    itemsize = jnp.dtype(dtype).itemsize

    x2d = x.reshape(M, H)                                   # no upcast: stream native dtype
    w_col = weight.reshape(H, 1).astype(dtype)               # transpose of nn.Linear weight
    b = bias.reshape(1).astype(jnp.float32)
    mask2d = mask_cls.astype(jnp.float32).reshape(M, 1)

    # Tile over M; tile rows must be a multiple of 8 (sublanes). Pad the tail.
    tm = min(block_m, max(8, ((M + 7) // 8) * 8))
    m_pad = pl.cdiv(M, tm) * tm
    if m_pad != M:
        x2d = jnp.pad(x2d, ((0, m_pad - M), (0, 0)))
        mask2d = jnp.pad(mask2d, ((0, m_pad - M), (0, 0)))   # padded rows -> mask 0 -> out 0

    grid = (m_pad // tm,)

    # Explicit VMEM budget: double-buffered x tile + mask/out tiles + weight + headroom.
    vmem_bytes = 2 * (tm * H * itemsize + 2 * tm * 4) + 2 * H * 4 + (4 << 20)
    vmem_bytes = int(min(max(vmem_bytes, 4 << 20), 48 << 20))

    out = pl.pallas_call(
        _classifier_kernel,
        out_shape=jax.ShapeDtypeStruct((m_pad, 1), jnp.float32),
        grid=grid,
        in_specs=[
            pl.BlockSpec((tm, H), lambda i: (i, 0)),          # streamed x tile
            pl.BlockSpec((H, 1), lambda i: (0, 0)),           # resident weight column
            pl.BlockSpec(memory_space=pltpu.MemorySpace.SMEM),  # scalar bias
            pl.BlockSpec((tm, 1), lambda i: (i, 0)),          # mask tile
        ],
        out_specs=pl.BlockSpec((tm, 1), lambda i: (i, 0)),
        compiler_params=pltpu.CompilerParams(
            dimension_semantics=("parallel",),
            vmem_limit_bytes=vmem_bytes,
        ),
    )(x2d, w_col, b, mask2d)

    return out[:M].reshape(B, S)


def init_params(hidden_size, key):
    # Mimic PyTorch nn.Linear default init: U(-1/sqrt(H), 1/sqrt(H))
    kw, kb = jax.random.split(key)
    bound = 1.0 / (hidden_size ** 0.5)
    weight = jax.random.uniform(kw, (1, hidden_size), jnp.float32, -bound, bound)
    bias = jax.random.uniform(kb, (1,), jnp.float32, -bound, bound)
    return weight, bias


def _reference(x, mask_cls, weight, bias):
    h = jnp.einsum("bsh,h->bs", x.astype(jnp.float32), weight[0]) + bias[0]
    return jax.nn.sigmoid(h) * mask_cls.astype(jnp.float32)


if __name__ == "__main__":
    key = jax.random.PRNGKey(0)

    # --- small demo shape (matches the module's forward) ---
    B, S, H = 2, 8, 32
    kx, km, kp, kx2, km2 = jax.random.split(key, 5)

    x = jax.random.normal(kx, (B, S, H), jnp.float32)
    mask_cls = jax.random.bernoulli(km, 0.8, (B, S))
    weight, bias = init_params(H, kp)

    sent_scores = classifier_forward(x, mask_cls, weight, bias)
    sent_scores = jax.block_until_ready(sent_scores)

    ref = _reference(x, mask_cls, weight, bias)
    assert sent_scores.shape == (B, S)
    assert jnp.allclose(sent_scores, ref, atol=1e-5, rtol=1e-5)

    # --- exercise multi-tile grid + tail padding (M not a multiple of the tile) ---
    B2, S2, H2 = 3, 137, 256
    x2 = jax.random.normal(kx2, (B2, S2, H2), jnp.float32)
    mask2 = jax.random.bernoulli(km2, 0.7, (B2, S2))
    w2, b2 = init_params(H2, kp)

    out2 = classifier_forward(x2, mask2, w2, b2, block_m=64)
    out2 = jax.block_until_ready(out2)
    ref2 = _reference(x2, mask2, w2, b2)
    assert out2.shape == (B2, S2)
    assert jnp.allclose(out2, ref2, atol=1e-4, rtol=1e-4)

    print("KERNEL_OK")
</pallas_src>

<mosaic_0001>
module attributes {stable_mosaic.version = 11 : i64} {
  func.func @_classifier_kernel(%arg0: i32, %arg1: memref<16x32xf32, #tpu.memory_space<vmem>>, %arg2: memref<32x1xf32, #tpu.memory_space<vmem>>, %arg3: memref<1xf32, #tpu.memory_space<smem>>, %arg4: memref<16x1xf32, #tpu.memory_space<vmem>>, %arg5: memref<16x1xf32, #tpu.memory_space<vmem>>) attributes {dimension_semantics = [#tpu.dimension_semantics<parallel>], iteration_bounds = array<i64: 1>, scalar_prefetch = 0 : i64, scratch_operands = 0 : i64, tpu.core_type = #tpu.core_type<tc>, window_params = [{transform_indices = @transform_0, window_bounds = array<i64: 16, 32>}, {pipeline_mode = #tpu.pipeline_mode<synchronous>, transform_indices = @transform_1, window_bounds = array<i64: 32, 1>}, {transform_indices = @transform_2, window_bounds = array<i64: 1>}, {transform_indices = @transform_3, window_bounds = array<i64: 16, 1>}, {transform_indices = @transform_4, window_bounds = array<i64: 16, 1>}]} {
    %c0 = arith.constant 0 : index
    %c0_0 = arith.constant 0 : index
    %0 = vector.load %arg1[%c0, %c0_0] : memref<16x32xf32, #tpu.memory_space<vmem>>, vector<16x32xf32>
    %c0_1 = arith.constant 0 : index
    %c0_2 = arith.constant 0 : index
    %1 = vector.load %arg2[%c0_1, %c0_2] : memref<32x1xf32, #tpu.memory_space<vmem>>, vector<32x1xf32>
    %cst = arith.constant dense<0.000000e+00> : vector<16x1xf32>
    %2 = tpu.matmul %0, %1, %cst {dimension_numbers = #tpu.dot_dimension_numbers<[1], [0], [0], [1], [0, 0, 1, 1], [], []>} : vector<16x32xf32>, vector<32x1xf32>, vector<16x1xf32> -> vector<16x1xf32>
    %c0_3 = arith.constant 0 : index
    %3 = memref.load %arg3[%c0_3] : memref<1xf32, #tpu.memory_space<smem>>
    %4 = vector.broadcast %3 : f32 to vector<16x1xf32>
    %5 = arith.addf %2, %4 : vector<16x1xf32>
    %6 = arith.negf %5 : vector<16x1xf32>
    %7 = math.exp %6 : vector<16x1xf32>
    %cst_4 = arith.constant 1.000000e+00 : f32
    %8 = vector.broadcast %cst_4 : f32 to vector<16x1xf32>
    %9 = arith.addf %8, %7 : vector<16x1xf32>
    %10 = arith.divf %8, %9 : vector<16x1xf32>
    %c0_5 = arith.constant 0 : index
    %c0_6 = arith.constant 0 : index
    %11 = vector.load %arg4[%c0_5, %c0_6] : memref<16x1xf32, #tpu.memory_space<vmem>>, vector<16x1xf32>
    %12 = arith.mulf %10, %11 : vector<16x1xf32>
    %c0_7 = arith.constant 0 : index
    %c0_8 = arith.constant 0 : index
    %13 = vector.load %arg5[%c0_7, %c0_8] : memref<16x1xf32, #tpu.memory_space<vmem>>, vector<16x1xf32>
    tpu.vector_store %arg5[%c0_7, %c0_8], %12 {strides = array<i32>} : memref<16x1xf32, #tpu.memory_space<vmem>>, vector<16x1xf32>,
    return
  }
  func.func @transform_0(%arg0: i32) -> (i32, i32) {
    %c0_i32 = arith.constant 0 : i32
    %c0_i32_0 = arith.constant 0 : i32
    return %arg0, %c0_i32 : i32, i32
  }
  func.func @transform_1(%arg0: i32) -> (i32, i32) {
    %c0_i32 = arith.constant 0 : i32
    %c0_i32_0 = arith.constant 0 : i32
    %c0_i32_1 = arith.constant 0 : i32
    return %c0_i32, %c0_i32_0 : i32, i32
  }
  func.func @transform_2(%arg0: i32) -> i32 {
    %c0_i32 = arith.constant 0 : i32
    %c0_i32_0 = arith.constant 0 : i32
    return %c0_i32 : i32
  }
  func.func @transform_3(%arg0: i32) -> (i32, i32) {
    %c0_i32 = arith.constant 0 : i32
    %c0_i32_0 = arith.constant 0 : i32
    return %arg0, %c0_i32 : i32, i32
  }
  func.func @transform_4(%arg0: i32) -> (i32, i32) {
    %c0_i32 = arith.constant 0 : i32
    %c0_i32_0 = arith.constant 0 : i32
    return %arg0, %c0_i32 : i32, i32
  }
}

</mosaic_0001>

<bundles_post_ra>
// kernel: tpu_custom_call.1
= control target key start
LH: loop header
LB: loop body
LE: loop exit
PB: predicated region body
PF: predicated region fallthrough
CT: control target
= control target key end

     0   :  { %vm26_vm0 = vcmask 261120   ;;  %vm124_vm1 = vcmask 7168   ;;  %s226_s1 = inlined_call_operand.vmem [shape: f32[32,1], index: 1, kind: input, shape index: {}]   ;;  %s227_s0 = inlined_call_operand.vmem [shape: f32[16,32], index: 0, kind: input, shape index: {}]   ;;  %s228_s2 = inlined_call_operand.<no memory space> [shape: f32[1], index: 2, kind: input, shape index: {}]   ;;  %s229_s3 = inlined_call_operand.vmem [shape: f32[16,1], index: 3, kind: input, shape index: {}]   ;;  %s230_s4 = inlined_call_operand.vmem [shape: f32[16,1], index: 4, kind: output, shape index: {}]  }
   0x1   :  { %v20_v0 = vld [vmem:[%s226_s1] sm:$0xff]  ;;  %v21_v1 = vld [vmem:[%s226_s1 + $0x8] sm:$0xff]  ;;  %v22_v2 = vld [vmem:[%s226_s1 + $0x10] sm:$0xff]  ;;  %v25_v8 = vstv %s228_s2 }
   0x2   :  { %v152_v3 = vpack.c.bf16 %v21_v1, %v20_v0  ;;  %v23_v4 = vld [vmem:[%s226_s1 + $0x18] sm:$0xff]  ;;  %v18_v5 = vld [vmem:[%s227_s0] sm:$0xff]  ;;  %v19_v7 = vld [vmem:[%s227_s0 + $0x8] sm:$0xff] }
   0x3   :  { %v156_v6 = vpack.c.bf16 %v23_v4, %v22_v2  ;;  %149 = vmatprep.mubr.msk.f32.mxu0 %vm26_vm0, %v18_v5  ;;  %v121_v19 = vld [vmem:[%s229_s3 + $0x8] sm:$0xff]  ;;  %v120_v20 = vld [vmem:[%s229_s3] sm:$0xff] }
   0x4   :  { %153 = vmatprep.subr.bf16.mxu0 %v152_v3 }
   0x5   :  { %155 = vmatpush3.bf16.msra.mxu0 %v152_v3 }
   0x6   :  { %157 = vmatprep.subr.bf16.mxu0 %v156_v6 }
   0x9   :  { %159 = vmatpush3.bf16.msra.mxu0 %v156_v6 }
   0xc   :  { %150 = vmatmul.mubr.msk.f32.vlgmr.msra.gmra.mrb[0].mxu0 %vm26_vm0, %v19_v7 }
  0xdf   :  { %v151_v9 = vpop.f32.mrb[0].mxu0 }
  0xe0   :  { %v105_v10 = vadd.f32 %v151_v9, %v25_v8  ;;  %v99_v11 = vpop.f32.mrb[1].mxu0 }
  0xe1   :  { %v100_v12 = vadd.f32 %v99_v11, %v25_v8 }
  0xe2   :  { %v134_v13 = vmul.f32 -1.442695, %v105_v10 }
  0xe3   :  { %v133_v14 = vmul.f32 -1.442695, %v100_v12 }
  0xe4   :  { %160 = vpow2.f32 %v134_v13 }
  0xe5   :  { %162 = vpow2.f32 %v133_v14 }
  0xee   :  { %v161_v15 = vpop.eup %160 }
  0xef   :  { %v163_v16 = vpop.eup %162  ;;  %v115_v17 = vadd.f32 1.0, %v161_v15 }
  0xf0   :  { %v114_v18 = vadd.f32 1.0, %v163_v16 }
  0xf1   :  { %164 = vrcp.f32 %v115_v17 }
  0xf2   :  { %166 = vrcp.f32 %v114_v18 }
  0xfb   :  { %v165_v21 = vpop.eup %164 }
  0xfc   :  { %v167_v22 = vpop.eup %166  ;;  %v123_v23 = vmul.f32 %v165_v21, %v121_v19 }
  0xfd   :  { %v122_v24 = vmul.f32 %v167_v22, %v120_v20 }
  0xfe   :  { %126 = vst.msk [vmem:[%s230_s4 + $0x8] sm:$0xff] %vm124_vm1, %v123_v23 }
  0xff   :  { %125 = vst.msk [vmem:[%s230_s4] sm:$0xff] %vm124_vm1, %v122_v24 }

</bundles_post_ra>
